<compile_context>
chip_gen: v6e
topology: v6e:2x2x1
jax: 0.10.0
libtpu: 0.0.40
codegen_flags: <defaults>
</compile_context>

<pallas_src>
import functools

import jax
import jax.numpy as jnp
from jax import lax
from jax.experimental import pallas as pl
from jax.experimental.pallas import tpu as pltpu


def _mlp_kernel(x_ref, w_in_ref, b_in_ref, w_h_ref, b_h_ref, w_out_ref, b_out_ref,
                o_ref, *, num_layers: int, binary: bool):
    """One batch tile: relu(x@Win+bin) -> num_layers x relu(.@Wh+bh) ->
    (sigmoid)(Wout @ h^T + bout), written transposed as (output_size, TB)."""
    # Hoist every parameter read (and the implied bias broadcasts) out of the
    # unrolled layer loop -- JAX does not CSE broadcast_in_dim.
    x = x_ref[...]
    w_in = w_in_ref[...]        # (input_size, width)   pre-transposed in wrapper
    b_in = b_in_ref[...]        # (1, width)
    w_h = w_h_ref[...]          # (width, width)        pre-transposed in wrapper
    b_h = b_h_ref[...]          # (1, width)
    w_out = w_out_ref[...]      # (output_size, width)  original PyTorch layout
    b_out = b_out_ref[...]      # (output_size, 1)

    # Input layer + ReLU (standard contraction on RHS dim 0: no RHS relayout).
    h = jnp.maximum(jnp.dot(x, w_in, preferred_element_type=jnp.float32) + b_in, 0.0)

    # Shared-weight hidden layer applied num_layers times (small static count -> unroll).
    for _ in range(num_layers):
        h = jnp.maximum(jnp.dot(h, w_h, preferred_element_type=jnp.float32) + b_h, 0.0)

    # Output layer computed directly in transposed form: logits^T = Wout @ h^T.
    # Result shape (output_size, TB) keeps the HBM store lane-dense even when
    # output_size == 1, and consumes Wout in its native (out, in) layout.  The single
    # h relayout per tile is cheap XLU work.
    logits_t = lax.dot_general(w_out, h, (((1,), (1,)), ((), ())),
                               preferred_element_type=jnp.float32) + b_out
    o_ref[...] = (jax.nn.sigmoid(logits_t) if binary else logits_t).astype(o_ref.dtype)


def _pick_batch_tile(B: int, block_b: int) -> int:
    """Full batch for small B; otherwise a lane-aligned (multiple-of-128) tile no
    larger than block_b, aiming for >= 2 grid steps so v7x's two TensorCores are
    both fed through the "parallel" grid axis."""
    if B <= 256:
        return B
    tb = min(block_b, -(-B // 2))     # target ~half the batch, capped by block_b
    tb = (tb // 128) * 128            # lane-aligned: keeps the (out, TB) store dense
    return B if tb < 128 else tb      # can't split cleanly -> single full-dim block


def _vmem_capacity_bytes() -> int:
    try:
        return int(pltpu.get_tpu_info().vmem_capacity_bytes)
    except Exception:
        return 64 << 20               # v7x per-TensorCore floor


@functools.partial(jax.jit, static_argnames=("num_layers", "output_size", "block_b"))
def mlp_forward(x, params, *, num_layers: int, output_size: int, block_b: int = 2048):
    """x: (B, input_size) f32. params: PyTorch-layout weights (out, in), biases (out,)."""
    binary = output_size < 3
    B, input_size = x.shape
    width = params["w_in"].shape[0]

    TB = _pick_batch_tile(B, block_b)
    n_blocks = pl.cdiv(B, TB)         # ragged tail handled by Pallas block masking
                                      # (no host-side pad / output-slice HBM copies)

    # One-time, fused (jitted) layout prep.
    w_in_t = params["w_in"].T                     # (input_size, width)
    w_h_t = params["w_h"].T                       # (width, width)
    b_in = params["b_in"].reshape(1, width)
    b_h = params["b_h"].reshape(1, width)
    w_out = params["w_out"]                       # (output_size, width)
    b_out = params["b_out"].reshape(output_size, 1)

    kernel = functools.partial(_mlp_kernel, num_layers=num_layers, binary=binary)

    def resident(a):
        # Constant block index: the block never changes, so it stays resident in
        # VMEM across the whole grid (no re-DMA per step).
        return pl.BlockSpec(a.shape, lambda i: (0,) * a.ndim)

    # Explicit VMEM budget: 2 pipeline buffers per spec + activation temporaries,
    # 2x headroom, clamped to 75% of this generation's VMEM capacity.
    f32 = 4
    vmem_bytes = f32 * (
        2 * TB * input_size                                              # x tiles
        + 2 * output_size * TB                                           # out tiles
        + 2 * (input_size * width + width * width + output_size * width)  # weights
        + 2 * (2 * width + output_size)                                  # biases
        + 2 * TB * width)                                                # h + temps
    vmem_limit = int(min(max(2 * vmem_bytes, 4 << 20),
                         int(0.75 * _vmem_capacity_bytes())))

    out_t = pl.pallas_call(
        kernel,
        out_shape=jax.ShapeDtypeStruct((output_size, B), jnp.float32),
        grid_spec=pl.GridSpec(
            grid=(n_blocks,),
            in_specs=[pl.BlockSpec((TB, input_size), lambda i: (i, 0)),
                      resident(w_in_t), resident(b_in),
                      resident(w_h_t), resident(b_h),
                      resident(w_out), resident(b_out)],
            out_specs=pl.BlockSpec((output_size, TB), lambda i: (0, i)),
        ),
        compiler_params=pltpu.CompilerParams(
            dimension_semantics=("parallel",),
            vmem_limit_bytes=vmem_limit),
    )(x, w_in_t, b_in, w_h_t, b_h, w_out, b_out)

    # Lane-dense (output_size, B) slab back to the module's (B, output_size) layout
    # (cheap fused XLA transpose in the jitted wrapper).
    return out_t.T


def _init_params(key, input_size, width, output_size):
    """Deterministic PyTorch-style uniform(-1/sqrt(fan_in), 1/sqrt(fan_in)) init."""
    ks = jax.random.split(key, 6)

    def lin(kw, kb, fan_in, fan_out):
        bound = 1.0 / jnp.sqrt(jnp.float32(fan_in))
        w = jax.random.uniform(kw, (fan_out, fan_in), jnp.float32, -bound, bound)
        b = jax.random.uniform(kb, (fan_out,), jnp.float32, -bound, bound)
        return w, b

    w_in, b_in = lin(ks[0], ks[1], input_size, width)
    w_h, b_h = lin(ks[2], ks[3], width, width)
    w_out, b_out = lin(ks[4], ks[5], width, output_size)
    return dict(w_in=w_in, b_in=b_in, w_h=w_h, b_h=b_h, w_out=w_out, b_out=b_out)


def _reference(x, p, num_layers, output_size):
    h = jnp.maximum(x @ p["w_in"].T + p["b_in"], 0.0)
    for _ in range(num_layers):
        h = jnp.maximum(h @ p["w_h"].T + p["b_h"], 0.0)
    logits = h @ p["w_out"].T + p["b_out"]
    return jax.nn.sigmoid(logits) if output_size < 3 else logits


if __name__ == "__main__":
    key = jax.random.PRNGKey(0)
    k1, k2, k3, k4 = jax.random.split(key, 4)

    # Binary head (output_size < 3 -> sigmoid), small single-tile batch.
    INPUT_SIZE, WIDTH, OUTPUT_SIZE, NUM_LAYERS, BATCH = 16, 32, 1, 2, 8
    params = _init_params(k1, INPUT_SIZE, WIDTH, OUTPUT_SIZE)
    x = jax.random.normal(k2, (BATCH, INPUT_SIZE), jnp.float32)
    out = jax.block_until_ready(
        mlp_forward(x, params, num_layers=NUM_LAYERS, output_size=OUTPUT_SIZE))
    ref = _reference(x, params, NUM_LAYERS, OUTPUT_SIZE)
    assert out.shape == (BATCH, OUTPUT_SIZE)
    assert jnp.allclose(out, ref, atol=1e-4, rtol=1e-4)

    # Ragged multi-tile batch: exercises the lane-aligned tiling, the "parallel"
    # batch grid axis, and Pallas-masked partial tail blocks (no host pad/slice).
    xb = jax.random.normal(k3, (300, INPUT_SIZE), jnp.float32)
    outb = jax.block_until_ready(
        mlp_forward(xb, params, num_layers=NUM_LAYERS, output_size=OUTPUT_SIZE))
    refb = _reference(xb, params, NUM_LAYERS, OUTPUT_SIZE)
    assert outb.shape == (300, OUTPUT_SIZE)
    assert jnp.allclose(outb, refb, atol=1e-4, rtol=1e-4)

    # Multi-class head (output_size >= 3 -> raw logits, no sigmoid).
    OUT_MC = 4
    params_mc = _init_params(k4, INPUT_SIZE, WIDTH, OUT_MC)
    out_mc = jax.block_until_ready(
        mlp_forward(x, params_mc, num_layers=NUM_LAYERS, output_size=OUT_MC))
    ref_mc = _reference(x, params_mc, NUM_LAYERS, OUT_MC)
    assert out_mc.shape == (BATCH, OUT_MC)
    assert jnp.allclose(out_mc, ref_mc, atol=1e-4, rtol=1e-4)

    print("KERNEL_OK")
</pallas_src>

<mosaic_0001>
module attributes {stable_mosaic.version = 11 : i64} {
  func.func @_mlp_kernel(%arg0: i32, %arg1: memref<8x16xf32, #tpu.memory_space<vmem>>, %arg2: memref<16x32xf32, #tpu.memory_space<vmem>>, %arg3: memref<1x32xf32, #tpu.memory_space<vmem>>, %arg4: memref<32x32xf32, #tpu.memory_space<vmem>>, %arg5: memref<1x32xf32, #tpu.memory_space<vmem>>, %arg6: memref<1x32xf32, #tpu.memory_space<vmem>>, %arg7: memref<1x1xf32, #tpu.memory_space<vmem>>, %arg8: memref<1x8xf32, #tpu.memory_space<vmem>>) attributes {dimension_semantics = [#tpu.dimension_semantics<parallel>], iteration_bounds = array<i64: 1>, scalar_prefetch = 0 : i64, scratch_operands = 0 : i64, tpu.core_type = #tpu.core_type<tc>, window_params = [{transform_indices = @transform_0, window_bounds = array<i64: 8, 16>}, {pipeline_mode = #tpu.pipeline_mode<synchronous>, transform_indices = @transform_1, window_bounds = array<i64: 16, 32>}, {pipeline_mode = #tpu.pipeline_mode<synchronous>, transform_indices = @transform_2, window_bounds = array<i64: 1, 32>}, {pipeline_mode = #tpu.pipeline_mode<synchronous>, transform_indices = @transform_3, window_bounds = array<i64: 32, 32>}, {pipeline_mode = #tpu.pipeline_mode<synchronous>, transform_indices = @transform_4, window_bounds = array<i64: 1, 32>}, {pipeline_mode = #tpu.pipeline_mode<synchronous>, transform_indices = @transform_5, window_bounds = array<i64: 1, 32>}, {pipeline_mode = #tpu.pipeline_mode<synchronous>, transform_indices = @transform_6, window_bounds = array<i64: 1, 1>}, {transform_indices = @transform_7, window_bounds = array<i64: 1, 8>}]} {
    %c0 = arith.constant 0 : index
    %c0_0 = arith.constant 0 : index
    %0 = vector.load %arg1[%c0, %c0_0] : memref<8x16xf32, #tpu.memory_space<vmem>>, vector<8x16xf32>
    %c0_1 = arith.constant 0 : index
    %c0_2 = arith.constant 0 : index
    %1 = vector.load %arg2[%c0_1, %c0_2] : memref<16x32xf32, #tpu.memory_space<vmem>>, vector<16x32xf32>
    %c0_3 = arith.constant 0 : index
    %c0_4 = arith.constant 0 : index
    %2 = vector.load %arg3[%c0_3, %c0_4] : memref<1x32xf32, #tpu.memory_space<vmem>>, vector<1x32xf32>
    %c0_5 = arith.constant 0 : index
    %c0_6 = arith.constant 0 : index
    %3 = vector.load %arg4[%c0_5, %c0_6] : memref<32x32xf32, #tpu.memory_space<vmem>>, vector<32x32xf32>
    %c0_7 = arith.constant 0 : index
    %c0_8 = arith.constant 0 : index
    %4 = vector.load %arg5[%c0_7, %c0_8] : memref<1x32xf32, #tpu.memory_space<vmem>>, vector<1x32xf32>
    %c0_9 = arith.constant 0 : index
    %c0_10 = arith.constant 0 : index
    %5 = vector.load %arg6[%c0_9, %c0_10] : memref<1x32xf32, #tpu.memory_space<vmem>>, vector<1x32xf32>
    %c0_11 = arith.constant 0 : index
    %c0_12 = arith.constant 0 : index
    %6 = vector.load %arg7[%c0_11, %c0_12] : memref<1x1xf32, #tpu.memory_space<vmem>>, vector<1x1xf32>
    %cst = arith.constant dense<0.000000e+00> : vector<8x32xf32>
    %7 = tpu.matmul %0, %1, %cst {dimension_numbers = #tpu.dot_dimension_numbers<[1], [0], [0], [1], [0, 0, 1, 1], [], []>} : vector<8x16xf32>, vector<16x32xf32>, vector<8x32xf32> -> vector<8x32xf32>
    %8 = vector.broadcast %2 : vector<1x32xf32> to vector<8x32xf32>
    %9 = arith.addf %7, %8 : vector<8x32xf32>
    %cst_13 = arith.constant 0.000000e+00 : f32
    %10 = vector.broadcast %cst_13 : f32 to vector<8x32xf32>
    %11 = arith.maximumf %9, %10 : vector<8x32xf32>
    %cst_14 = arith.constant dense<0.000000e+00> : vector<8x32xf32>
    %12 = tpu.matmul %11, %3, %cst_14 {dimension_numbers = #tpu.dot_dimension_numbers<[1], [0], [0], [1], [0, 0, 1, 1], [], []>} : vector<8x32xf32>, vector<32x32xf32>, vector<8x32xf32> -> vector<8x32xf32>
    %13 = vector.broadcast %4 : vector<1x32xf32> to vector<8x32xf32>
    %14 = arith.addf %12, %13 : vector<8x32xf32>
    %cst_15 = arith.constant 0.000000e+00 : f32
    %15 = vector.broadcast %cst_15 : f32 to vector<8x32xf32>
    %16 = arith.maximumf %14, %15 : vector<8x32xf32>
    %cst_16 = arith.constant dense<0.000000e+00> : vector<8x32xf32>
    %17 = tpu.matmul %16, %3, %cst_16 {dimension_numbers = #tpu.dot_dimension_numbers<[1], [0], [0], [1], [0, 0, 1, 1], [], []>} : vector<8x32xf32>, vector<32x32xf32>, vector<8x32xf32> -> vector<8x32xf32>
    %18 = vector.broadcast %4 : vector<1x32xf32> to vector<8x32xf32>
    %19 = arith.addf %17, %18 : vector<8x32xf32>
    %cst_17 = arith.constant 0.000000e+00 : f32
    %20 = vector.broadcast %cst_17 : f32 to vector<8x32xf32>
    %21 = arith.maximumf %19, %20 : vector<8x32xf32>
    %cst_18 = arith.constant dense<0.000000e+00> : vector<1x8xf32>
    %22 = tpu.matmul %5, %21, %cst_18 {dimension_numbers = #tpu.dot_dimension_numbers<[1], [1], [0], [0], [0, 0, 1, 0], [], []>} : vector<1x32xf32>, vector<8x32xf32>, vector<1x8xf32> -> vector<1x8xf32>
    %23 = vector.broadcast %6 : vector<1x1xf32> to vector<1x8xf32>
    %24 = arith.addf %22, %23 : vector<1x8xf32>
    %25 = arith.negf %24 : vector<1x8xf32>
    %26 = math.exp %25 : vector<1x8xf32>
    %cst_19 = arith.constant 1.000000e+00 : f32
    %27 = vector.broadcast %cst_19 : f32 to vector<1x8xf32>
    %28 = arith.addf %27, %26 : vector<1x8xf32>
    %29 = arith.divf %27, %28 : vector<1x8xf32>
    %c0_20 = arith.constant 0 : index
    %c0_21 = arith.constant 0 : index
    %30 = vector.load %arg8[%c0_20, %c0_21] : memref<1x8xf32, #tpu.memory_space<vmem>>, vector<1x8xf32>
    tpu.vector_store %arg8[%c0_20, %c0_21], %29 {strides = array<i32>} : memref<1x8xf32, #tpu.memory_space<vmem>>, vector<1x8xf32>,
    return
  }
  func.func @transform_0(%arg0: i32) -> (i32, i32) {
    %c0_i32 = arith.constant 0 : i32
    %c0_i32_0 = arith.constant 0 : i32
    return %arg0, %c0_i32 : i32, i32
  }
  func.func @transform_1(%arg0: i32) -> (i32, i32) {
    %c0_i32 = arith.constant 0 : i32
    %c0_i32_0 = arith.constant 0 : i32
    %c0_i32_1 = arith.constant 0 : i32
    return %c0_i32, %c0_i32_0 : i32, i32
  }
  func.func @transform_2(%arg0: i32) -> (i32, i32) {
    %c0_i32 = arith.constant 0 : i32
    %c0_i32_0 = arith.constant 0 : i32
    %c0_i32_1 = arith.constant 0 : i32
    return %c0_i32, %c0_i32_0 : i32, i32
  }
  func.func @transform_3(%arg0: i32) -> (i32, i32) {
    %c0_i32 = arith.constant 0 : i32
    %c0_i32_0 = arith.constant 0 : i32
    %c0_i32_1 = arith.constant 0 : i32
    return %c0_i32, %c0_i32_0 : i32, i32
  }
  func.func @transform_4(%arg0: i32) -> (i32, i32) {
    %c0_i32 = arith.constant 0 : i32
    %c0_i32_0 = arith.constant 0 : i32
    %c0_i32_1 = arith.constant 0 : i32
    return %c0_i32, %c0_i32_0 : i32, i32
  }
  func.func @transform_5(%arg0: i32) -> (i32, i32) {
    %c0_i32 = arith.constant 0 : i32
    %c0_i32_0 = arith.constant 0 : i32
    %c0_i32_1 = arith.constant 0 : i32
    return %c0_i32, %c0_i32_0 : i32, i32
  }
  func.func @transform_6(%arg0: i32) -> (i32, i32) {
    %c0_i32 = arith.constant 0 : i32
    %c0_i32_0 = arith.constant 0 : i32
    %c0_i32_1 = arith.constant 0 : i32
    return %c0_i32, %c0_i32_0 : i32, i32
  }
  func.func @transform_7(%arg0: i32) -> (i32, i32) {
    %c0_i32 = arith.constant 0 : i32
    %c0_i32_0 = arith.constant 0 : i32
    return %c0_i32, %arg0 : i32, i32
  }
}

</mosaic_0001>

<bundles_post_ra>
// kernel: mlp_forward.1
= control target key start
LH: loop header
LB: loop body
LE: loop exit
PB: predicated region body
PF: predicated region fallthrough
CT: control target
= control target key end

     0   :  { %s559_s0 = inlined_call_operand.vmem [shape: f32[8,16], index: 0, kind: input, shape index: {}]   ;;  %s560_s1 = inlined_call_operand.vmem [shape: f32[16,32], index: 1, kind: input, shape index: {}]   ;;  %s561_s2 = inlined_call_operand.vmem [shape: f32[1,32], index: 2, kind: input, shape index: {}]   ;;  %s562_s3 = inlined_call_operand.vmem [shape: f32[32,32], index: 3, kind: input, shape index: {}]   ;;  %s563_s4 = inlined_call_operand.vmem [shape: f32[1,32], index: 4, kind: input, shape index: {}]   ;;  %s564_s5 = inlined_call_operand.vmem [shape: f32[1,32], index: 5, kind: input, shape index: {}]   ;;  %s565_s6 = inlined_call_operand.<no memory space> [shape: f32[1,1], index: 6, kind: input, shape index: {}]   ;;  %s566_s7 = inlined_call_operand.hbm [shape: f32[1,8], index: 7, kind: output, shape index: {}]  }
   0x1   :  { %v12_v0 = vstv %s565_s6 }
   0x2   :  { %13 = vst [vmem:[#allocation2] sm:$0x1] %v12_v0 }
   0x3   :  { %v31_v1 = vld [vmem:[%s560_s1 + $0x8] sm:$0xff]  ;;  %v471_v2 = vmov 0.0   ;;  %v30_v3 = vld [vmem:[%s560_s1] sm:$0xff]  ;;  %vm472_vm0 = vmmov 0   ;;  %v36_v4 = vld [vmem:[%s562_s3 + $0x18] sm:$0xff] }
   0x4   :  { %406 = vmatprep.subr.mxu0 %v471_v2  ;;  %410 = vmatprep.mubr.msk.f32.mxu0 %vm472_vm0, %v471_v2 }
   0x5   :  { %14 = vsyncpa [#allocation4], 0  ;;  %407 = vmatpush3.msra.mxu0 %v31_v1  ;;  %v29_v5 = vld [vmem:[%s559_s0] sm:$0xff]  ;;  %vm46_vm1 = vcmask 130048   ;;  %413 = vmatprep.subr.mxu1 %v471_v2  ;;  %v35_v6 = vld [vmem:[%s562_s3 + $0x10] sm:$0xff]  ;;  %vm127_vm2 = vcmask 261120   ;;  %v281_v26 = vlaneseq }
   0x6   :  { %408 = vmatprep.subr.mxu0 %v471_v2  ;;  %414 = vmatpush3.msra.mxu1 %v36_v4  ;;  %v34_v7 = vld [vmem:[%s562_s3 + $0x8] sm:$0xff]  ;;  %v33_v8 = vld [vmem:[%s562_s3] sm:$0xff]  ;;  %v473_v20 = vmov 0   ;;  %vm367_vm3 = vcmask 57344  }
   0x7   :  { %409 = vmatpush3.msra.mxu0 %v30_v3  ;;  %415 = vmatprep.subr.mxu1 %v471_v2  ;;  %v383_v9 = vld [vmem:[%s561_s2] ss:$0 sm:$0xff]  ;;  %v282_v27 = vshrl.u32 %v281_v26, 7 }
   0x8   :  { %411 = vmatmul.mubr.msk.f32.vlgmr.msra.gmra.mxu0 %vm46_vm1, %v29_v5  ;;  %421 = vmatprep.mubr.msk.f32.mxu1 %vm472_vm0, %v471_v2  ;;  %v385_v14 = vld [vmem:[%s563_s4] ss:$0 sm:$0xff]  ;;  %s474_s4 = smov [#allocation3]  }
   0x9   :  { %424 = vmatprep.subr.mxu0 %v471_v2  ;;  %432 = vmatprep.mubr.msk.f32.mxu0 %vm472_vm0, %v471_v2  ;;  %v39_v19 = vld [vmem:[#allocation2] sm:$0x1]  ;;  %v283_v28 = vsub.s32 0, %v282_v27  ;;  %s375_s18 = sshll.u32 %s474_s4, 4  ;;  %s376_s18 = int_to_ptr.vmem [resolvable:$true] %s375_s18 }
   0xa   :  { %425 = vmatpush3.msra.mxu0 %v36_v4  ;;  %416 = vmatpush3.msra.mxu1 %v35_v6  ;;  %v38_v25 = vld [vmem:[%s564_s5] sm:$0x1]  ;;  %s449_s5 = scalar_lea.vmem %s376_s18, 16  ;;  %s453_s19 = scalar_lea.vmem %s376_s18, 32 }
   0xb   :  { %426 = vmatprep.subr.mxu0 %v471_v2  ;;  %417 = vmatprep.subr.mxu1 %v471_v2  ;;  %p450_p0 = scmp.ne.s32.totalorder %s376_s18, %s449_s5  ;;  %p454_p1 = scmp.lt.s32.totalorder %s376_s18, %s376_s18 }
   0xc   :  { %427 = vmatpush3.msra.mxu0 %v35_v6  ;;  %418 = vmatpush3.msra.mxu1 %v34_v7  ;;  %p455_p2 = scmp.lt.s32.totalorder %s453_s19, %s449_s5 }
   0xd   :  { %428 = vmatprep.subr.mxu0 %v471_v2  ;;  %419 = vmatprep.subr.mxu1 %v471_v2 }
   0xe   :  { %429 = vmatpush3.msra.mxu0 %v34_v7  ;;  %420 = vmatpush3.msra.mxu1 %v33_v8  ;;  %p456_p3 = por %p455_p2, %p454_p1 }
   0xf   :  { %430 = vmatprep.subr.mxu0 %v471_v2  ;;  %435 = vmatprep.subr.mxu1 %v471_v2 }
  0x10   :  { %431 = vmatpush3.msra.mxu0 %v33_v8  ;;  %444 = vset.pattern.permute.xlu0 %v473_v20  ;;  %p457_p4 = pnand %p456_p3, %p450_p0 }
  0x11   :  { %278 = vperm.xlu0 %444, %v39_v19  }
  0x8c   :  { %v279_v29 = vpop.permute.xlu0 %278 }
  0x8d   :  { %v284_v30 = vrot.slane %v279_v29, %v283_v28 }
  0xc8   :  { %v116_v10 = vpop.f32.mrf.mxu0 }
  0xc9   :  { %v117_v11 = vadd.f32 %v383_v9, %v116_v10 }
  0xca   :  { %v412_v12 = vpop.f32.mrf.mxu0 }
  0xcb   :  { %v120_v13 = vmax.f32 %v117_v11, 0.0 }
  0xcd   :  { %422 = vmatmul.mubr.msk.f32.vlgmr.msra.gmra.mxu1 %vm127_vm2, %v120_v13 }
  0xce   :  { %437 = vmatprep.mubr.msk.f32.mxu1 %vm472_vm0, %v471_v2 }
 0x18d   :  { %v197_v15 = vpop.f32.mrf.mxu1 }
 0x18e   :  { %v198_v16 = vadd.f32 %v385_v14, %v197_v15 }
 0x18f   :  { %v423_v17 = vpop.f32.mrf.mxu1 }
 0x190   :  { %v201_v18 = vmax.f32 %v198_v16, 0.0 }
 0x192   :  { %433 = vmatmul.mubr.msk.f32.vlgmr.msra.gmra.mxu0 %vm127_vm2, %v201_v18 }
 0x252   :  { %v271_v21 = vpop.f32.mrf.mxu0 }
 0x253   :  { %v272_v22 = vadd.f32 %v385_v14, %v271_v21 }
 0x254   :  { %v434_v23 = vpop.f32.mrf.mxu0 }
 0x255   :  { %v275_v24 = vmax.f32 %v272_v22, 0.0 }
 0x257   :  { %436 = vmatpush3.xpose.msk.msra.mxu1 %vm127_vm2, %v275_v24 }
 0x25a   :  { %438 = vmatmul.mubr.msk.f32.vlgmr.msra.gmra.mxu1 %vm127_vm2, %v38_v25 }
 0x31a   :  { %v357_v31 = vpop.f32.mrf.mxu1 }
 0x31b   :  { %v358_v32 = vadd.f32 %v357_v31, %v284_v30 }
 0x31c   :  { %v439_v33 = vpop.f32.mrf.mxu1 }
 0x31d   :  { %v390_v34 = vmul.f32 -1.442695, %v358_v32 }
 0x31f   :  { %445 = vpow2.f32 %v390_v34 }
 0x32c   :  { %v446_v35 = vpop.eup %445 }
 0x32d   :  { %v364_v36 = vadd.f32 1.0, %v446_v35 }
 0x32f   :  { %447 = vrcp.f32 %v364_v36 }
 0x33c   :  { %v448_v37 = vpop.eup %447 }
 0x33d   :  { %368 = vst.msk [vmem:[#allocation3] sm:$0x1] %vm367_vm3, %v448_v37 }
 0x33e   :  { %460 = shalt.err (!%p457_p4)
}
 0x33f   :  { %378 = dma.vmem_to_hbm [thread:$0]  %s376_s18, 16, %s566_s7, [#allocation4]  }
 0x340   :  { %469 = dma.done.wait [#allocation4], 16  }
 0x341   :  { %470 = vsyncadd [#allocation4], 4294967280 }
 0x342   :  { %382 = vsyncpa [#allocation4], 1 }

</bundles_post_ra>
